<compile_context>
chip_gen: v7x
topology: tpu7x:2x2x1
jax: 0.10.0
libtpu: 0.0.40
codegen_flags: <defaults>
</compile_context>

<pallas_src>
import jax
import jax.numpy as jnp
from jax.experimental import pallas as pl
from jax.experimental.pallas import tpu as pltpu


def _round_up(x, m):
    return ((x + m - 1) // m) * m


def _make_conv_stats_kernel():
    """Pass 1: per-tile im2col matmul + streaming per-channel (sum, sumsq)."""

    def kernel(p_ref, w_ref, acc_ref, stats_ref):
        # p_ref:     [TM, K]   patch tile (MXU feed dtype)
        # w_ref:     [K,  Cp]  weight matrix (resident: constant block index)
        # acc_ref:   [TM, Cp]  f32 conv output tile (written per iteration)
        # stats_ref: [8,  Cp]  f32 accumulator, same block every iteration:
        #                      row0 = sum, row1 = sum of squares
        i = pl.program_id(0)

        @pl.when(i == 0)
        def _init():
            stats_ref[...] = jnp.zeros_like(stats_ref)

        acc = jnp.dot(p_ref[...], w_ref[...],
                      preferred_element_type=jnp.float32)          # [TM, Cp]
        acc_ref[...] = acc

        stats_ref[0:1, :] = stats_ref[0:1, :] + jnp.sum(acc, axis=0,
                                                        keepdims=True)
        stats_ref[1:2, :] = stats_ref[1:2, :] + jnp.sum(acc * acc, axis=0,
                                                        keepdims=True)

    return kernel


def _make_bn_prelu_kernel(m_total, eps, linear):
    """Pass 2: normalize with global batch stats + per-channel PReLU."""
    inv_m = 1.0 / float(m_total)

    def kernel(stats_ref, prm_ref, acc_ref, o_ref):
        # stats_ref: [8, Cp]  row0 = sum, row1 = sumsq (over real M rows)
        # prm_ref:   [8, Cp]  row0 = gamma, row1 = beta, row2 = alpha
        # acc_ref:   [TM, Cp] f32 conv output tile
        # o_ref:     [TM, Cp] output tile
        mean = stats_ref[0:1, :] * inv_m
        var = jnp.maximum(stats_ref[1:2, :] * inv_m - mean * mean, 0.0)
        inv = jax.lax.rsqrt(var + eps)
        gamma = prm_ref[0:1, :]
        beta = prm_ref[1:2, :]
        scale = inv * gamma                      # fold BN into scale/shift
        shift = beta - mean * scale
        y = acc_ref[...] * scale + shift
        if not linear:
            alpha = prm_ref[2:3, :]
            y = jnp.where(y >= 0, y, alpha * y)
        o_ref[...] = y.astype(o_ref.dtype)

    return kernel


def conv_block_forward(x_nchw, weight_oihw, gamma, beta, alpha=None, *,
                       stride, padding, eps=1e-5, linear=False,
                       mxu_dtype=None, tm=128):
    """Fused ConvBlock forward. x_nchw: [N, Cin, H, W] (PyTorch layout).

    mxu_dtype: optional dtype for the MXU operands (e.g. jnp.bfloat16 on
               v6e/v7x); accumulation and BN/PReLU stay f32.
    """
    N, Cin, H, W = x_nchw.shape
    Cout, Cin_w, KH, KW = weight_oihw.shape
    assert Cin_w == Cin, "only groups=1 supported here"

    Ho = (H + 2 * padding - KH) // stride + 1
    Wo = (W + 2 * padding - KW) // stride + 1
    M = N * Ho * Wo
    K = KH * KW * Cin                      # NOT padded to 128 (lane-exempt)
    Cp = _round_up(Cout, 128)              # lane-dense output channels
    TM = min(tm, _round_up(M, 8))
    Mp = _round_up(M, TM)                  # zero row padding: stats unaffected
    Mt = Mp // TM

    feed_dtype = x_nchw.dtype if mxu_dtype is None else mxu_dtype

    # ---- layout prep (plain JAX; fuses under jit) ----
    # TODO(synk): fuse im2col into pass 1 for large H*W (avoids the KH*KW x
    #             duplication of the input in HBM).
    x_nhwc = jnp.transpose(x_nchw, (0, 2, 3, 1))
    xp = jnp.pad(x_nhwc, ((0, 0), (padding, padding), (padding, padding),
                          (0, 0)))
    taps = []
    for kh in range(KH):
        for kw in range(KW):
            taps.append(xp[:,
                           kh:kh + (Ho - 1) * stride + 1:stride,
                           kw:kw + (Wo - 1) * stride + 1:stride,
                           :])                                    # [N,Ho,Wo,Cin]
    patches = jnp.concatenate(taps, axis=-1).reshape(M, K)        # [M, K]
    if Mp != M:
        patches = jnp.pad(patches, ((0, Mp - M), (0, 0)))
    patches = patches.astype(feed_dtype)

    # weight: OIHW -> HWIO -> [K, Cout] (matches tap concat order), pad Cout.
    w_mat = jnp.transpose(weight_oihw, (2, 3, 1, 0)).reshape(K, Cout)
    w_mat = jnp.pad(w_mat, ((0, 0), (0, Cp - Cout))).astype(feed_dtype)

    # packed BN/PReLU parameters: one aligned (8, Cp) f32 tile.
    prm = jnp.zeros((8, Cp), jnp.float32)
    prm = prm.at[0, :Cout].set(gamma.astype(jnp.float32))
    prm = prm.at[1, :Cout].set(beta.astype(jnp.float32))
    if not linear:
        prm = prm.at[2, :Cout].set(alpha.astype(jnp.float32))

    # ---- pass 1: tiled conv matmul + streaming per-channel stats ----
    acc, stats = pl.pallas_call(
        _make_conv_stats_kernel(),
        grid=(Mt,),
        in_specs=[
            pl.BlockSpec((TM, K), lambda i: (i, 0)),
            pl.BlockSpec((K, Cp), lambda i: (0, 0)),
        ],
        out_specs=[
            pl.BlockSpec((TM, Cp), lambda i: (i, 0)),
            pl.BlockSpec((8, Cp), lambda i: (0, 0)),
        ],
        out_shape=[
            jax.ShapeDtypeStruct((Mp, Cp), jnp.float32),
            jax.ShapeDtypeStruct((8, Cp), jnp.float32),
        ],
        compiler_params=pltpu.CompilerParams(
            dimension_semantics=("arbitrary",)),   # stats block is revisited
    )(patches, w_mat)

    # ---- pass 2: normalize + PReLU (fully parallel over M tiles) ----
    out_mat = pl.pallas_call(
        _make_bn_prelu_kernel(M, float(eps), bool(linear)),
        grid=(Mt,),
        in_specs=[
            pl.BlockSpec((8, Cp), lambda i: (0, 0)),
            pl.BlockSpec((8, Cp), lambda i: (0, 0)),
            pl.BlockSpec((TM, Cp), lambda i: (i, 0)),
        ],
        out_specs=pl.BlockSpec((TM, Cp), lambda i: (i, 0)),
        out_shape=jax.ShapeDtypeStruct((Mp, Cp), x_nchw.dtype),
        compiler_params=pltpu.CompilerParams(
            dimension_semantics=("parallel",)),
    )(stats, prm, acc)

    # un-pad rows/channels, restore NCHW (fused under jit).
    out = out_mat[:M, :Cout].reshape(N, Ho, Wo, Cout)
    return jnp.transpose(out, (0, 3, 1, 2))


def _reference_forward(x_nchw, weight_oihw, gamma, beta, alpha, *, stride,
                       padding, eps=1e-5, linear=False):
    """Plain-JAX reference matching the PyTorch module (training-mode BN)."""
    y = jax.lax.conv_general_dilated(
        x_nchw, weight_oihw,
        window_strides=(stride, stride),
        padding=[(padding, padding), (padding, padding)],
        dimension_numbers=("NCHW", "OIHW", "NCHW"),
    )
    mean = jnp.mean(y, axis=(0, 2, 3), keepdims=True)
    var = jnp.mean((y - mean) ** 2, axis=(0, 2, 3), keepdims=True)
    y = (y - mean) * jax.lax.rsqrt(var + eps)
    y = y * gamma.reshape(1, -1, 1, 1) + beta.reshape(1, -1, 1, 1)
    if not linear:
        a = alpha.reshape(1, -1, 1, 1)
        y = jnp.where(y >= 0, y, a * y)
    return y


if __name__ == "__main__":
    # ConvBlock(inp=4, oup=8, k=3, s=1, p=1, dw=False, linear=False)
    inp, oup, k, s, p = 4, 8, 3, 1, 1
    N, H, W = 2, 16, 16

    key = jax.random.PRNGKey(0)
    kx, kw, kg, kb, ka = jax.random.split(key, 5)

    x = jax.random.normal(kx, (N, inp, H, W), dtype=jnp.float32)
    weight = jax.random.normal(kw, (oup, inp, k, k), dtype=jnp.float32) * 0.1
    gamma = 1.0 + 0.1 * jax.random.normal(kg, (oup,), dtype=jnp.float32)
    beta = 0.1 * jax.random.normal(kb, (oup,), dtype=jnp.float32)
    alpha = 0.25 + 0.05 * jax.random.normal(ka, (oup,), dtype=jnp.float32)

    fwd = jax.jit(conv_block_forward,
                  static_argnames=("stride", "padding", "eps", "linear",
                                   "mxu_dtype", "tm"))

    ref = _reference_forward(x, weight, gamma, beta, alpha,
                             stride=s, padding=p, linear=False)
    ref = jax.block_until_ready(ref)

    # f32 MXU feed (exact path; matches v5e where bf16 VPU/EUP are absent).
    out = fwd(x, weight, gamma, beta, alpha, stride=s, padding=p, linear=False)
    out = jax.block_until_ready(out)
    assert out.shape == (N, oup, H, W), out.shape
    assert jnp.allclose(out, ref, atol=2e-4, rtol=2e-4), (
        float(jnp.max(jnp.abs(out - ref))))

    # bf16 MXU feed (recommended on v6e/v7x): halves patch HBM traffic and
    # runs the MXU at full rate; looser tolerance vs the f32 reference.
    out_bf16 = fwd(x, weight, gamma, beta, alpha, stride=s, padding=p,
                   linear=False, mxu_dtype=jnp.bfloat16)
    out_bf16 = jax.block_until_ready(out_bf16)
    assert jnp.allclose(out_bf16, ref, atol=2e-2, rtol=2e-2), (
        float(jnp.max(jnp.abs(out_bf16 - ref))))

    print("KERNEL_OK")
</pallas_src>

<mosaic_0001>
module attributes {stable_mosaic.version = 11 : i64} {
  func.func @kernel(%arg0: i32, %arg1: memref<128x36xf32, #tpu.memory_space<vmem>>, %arg2: memref<36x128xf32, #tpu.memory_space<vmem>>, %arg3: memref<128x128xf32, #tpu.memory_space<vmem>>, %arg4: memref<8x128xf32, #tpu.memory_space<vmem>>) attributes {dimension_semantics = [#tpu.dimension_semantics<arbitrary>], iteration_bounds = array<i64: 4>, scalar_prefetch = 0 : i64, scratch_operands = 0 : i64, tpu.core_type = #tpu.core_type<tc>, window_params = [{transform_indices = @transform_0, window_bounds = array<i64: 128, 36>}, {pipeline_mode = #tpu.pipeline_mode<synchronous>, transform_indices = @transform_1, window_bounds = array<i64: 36, 128>}, {transform_indices = @transform_2, window_bounds = array<i64: 128, 128>}, {pipeline_mode = #tpu.pipeline_mode<synchronous>, transform_indices = @transform_3, window_bounds = array<i64: 8, 128>}]} {
    %c0_i32 = arith.constant 0 : i32
    %0 = arith.cmpi eq, %arg0, %c0_i32 : i32
    %1 = arith.extui %0 : i1 to i32
    %c0_i32_0 = arith.constant 0 : i32
    %2 = arith.cmpi ne, %1, %c0_i32_0 : i32
    scf.if %2 {
      %cst_15 = arith.constant 0.000000e+00 : f32
      %18 = vector.broadcast %cst_15 : f32 to vector<8x128xf32>
      %c0_16 = arith.constant 0 : index
      %c0_17 = arith.constant 0 : index
      %19 = vector.load %arg4[%c0_16, %c0_17] : memref<8x128xf32, #tpu.memory_space<vmem>>, vector<8x128xf32>
      tpu.vector_store %arg4[%c0_16, %c0_17], %18 {strides = array<i32>} : memref<8x128xf32, #tpu.memory_space<vmem>>, vector<8x128xf32>,
    } else {
    }
    %c0 = arith.constant 0 : index
    %c0_1 = arith.constant 0 : index
    %3 = vector.load %arg1[%c0, %c0_1] : memref<128x36xf32, #tpu.memory_space<vmem>>, vector<128x36xf32>
    %c0_2 = arith.constant 0 : index
    %c0_3 = arith.constant 0 : index
    %4 = vector.load %arg2[%c0_2, %c0_3] : memref<36x128xf32, #tpu.memory_space<vmem>>, vector<36x128xf32>
    %cst = arith.constant dense<0.000000e+00> : vector<128x128xf32>
    %5 = tpu.matmul %3, %4, %cst {dimension_numbers = #tpu.dot_dimension_numbers<[1], [0], [0], [1], [0, 0, 1, 1], [], []>} : vector<128x36xf32>, vector<36x128xf32>, vector<128x128xf32> -> vector<128x128xf32>
    %c0_4 = arith.constant 0 : index
    %c0_5 = arith.constant 0 : index
    %6 = vector.load %arg3[%c0_4, %c0_5] : memref<128x128xf32, #tpu.memory_space<vmem>>, vector<128x128xf32>
    tpu.vector_store %arg3[%c0_4, %c0_5], %5 {strides = array<i32>} : memref<128x128xf32, #tpu.memory_space<vmem>>, vector<128x128xf32>,
    %c0_6 = arith.constant 0 : index
    %c0_7 = arith.constant 0 : index
    %7 = vector.load %arg4[%c0_6, %c0_7] : memref<8x128xf32, #tpu.memory_space<vmem>>, vector<1x128xf32>
    %cst_8 = arith.constant dense<0.000000e+00> : vector<128xf32>
    %8 = vector.multi_reduction <add>, %5, %cst_8 [0] : vector<128x128xf32> to vector<128xf32>
    %9 = vector.shape_cast %8 : vector<128xf32> to vector<1x128xf32>
    %10 = arith.addf %7, %9 : vector<1x128xf32>
    %c0_9 = arith.constant 0 : index
    %c0_10 = arith.constant 0 : index
    %11 = vector.load %arg4[%c0_9, %c0_10] : memref<8x128xf32, #tpu.memory_space<vmem>>, vector<1x128xf32>
    tpu.vector_store %arg4[%c0_9, %c0_10], %10 {strides = array<i32>} : memref<8x128xf32, #tpu.memory_space<vmem>>, vector<1x128xf32>,
    %c1 = arith.constant 1 : index
    %c0_11 = arith.constant 0 : index
    %12 = vector.load %arg4[%c1, %c0_11] : memref<8x128xf32, #tpu.memory_space<vmem>>, vector<1x128xf32>
    %13 = arith.mulf %5, %5 : vector<128x128xf32>
    %cst_12 = arith.constant dense<0.000000e+00> : vector<128xf32>
    %14 = vector.multi_reduction <add>, %13, %cst_12 [0] : vector<128x128xf32> to vector<128xf32>
    %15 = vector.shape_cast %14 : vector<128xf32> to vector<1x128xf32>
    %16 = arith.addf %12, %15 : vector<1x128xf32>
    %c1_13 = arith.constant 1 : index
    %c0_14 = arith.constant 0 : index
    %17 = vector.load %arg4[%c1_13, %c0_14] : memref<8x128xf32, #tpu.memory_space<vmem>>, vector<1x128xf32>
    tpu.vector_store %arg4[%c1_13, %c0_14], %16 {strides = array<i32>} : memref<8x128xf32, #tpu.memory_space<vmem>>, vector<1x128xf32>,
    return
  }
  func.func @transform_0(%arg0: i32) -> (i32, i32) {
    %c0_i32 = arith.constant 0 : i32
    %c0_i32_0 = arith.constant 0 : i32
    return %arg0, %c0_i32 : i32, i32
  }
  func.func @transform_1(%arg0: i32) -> (i32, i32) {
    %c0_i32 = arith.constant 0 : i32
    %c0_i32_0 = arith.constant 0 : i32
    %c0_i32_1 = arith.constant 0 : i32
    return %c0_i32, %c0_i32_0 : i32, i32
  }
  func.func @transform_2(%arg0: i32) -> (i32, i32) {
    %c0_i32 = arith.constant 0 : i32
    %c0_i32_0 = arith.constant 0 : i32
    return %arg0, %c0_i32 : i32, i32
  }
  func.func @transform_3(%arg0: i32) -> (i32, i32) {
    %c0_i32 = arith.constant 0 : i32
    %c0_i32_0 = arith.constant 0 : i32
    %c0_i32_1 = arith.constant 0 : i32
    return %c0_i32, %c0_i32_0 : i32, i32
  }
}

module attributes {stable_mosaic.version = 11 : i64} {
  func.func @kernel(%arg0: i32, %arg1: memref<8x128xf32, #tpu.memory_space<vmem>>, %arg2: memref<8x128xf32, #tpu.memory_space<vmem>>, %arg3: memref<128x128xf32, #tpu.memory_space<vmem>>, %arg4: memref<128x128xf32, #tpu.memory_space<vmem>>) attributes {dimension_semantics = [#tpu.dimension_semantics<parallel>], iteration_bounds = array<i64: 4>, scalar_prefetch = 0 : i64, scratch_operands = 0 : i64, tpu.core_type = #tpu.core_type<tc>, window_params = [{pipeline_mode = #tpu.pipeline_mode<synchronous>, transform_indices = @transform_0, window_bounds = array<i64: 8, 128>}, {pipeline_mode = #tpu.pipeline_mode<synchronous>, transform_indices = @transform_1, window_bounds = array<i64: 8, 128>}, {transform_indices = @transform_2, window_bounds = array<i64: 128, 128>}, {transform_indices = @transform_3, window_bounds = array<i64: 128, 128>}]} {
    %c0 = arith.constant 0 : index
    %c0_0 = arith.constant 0 : index
    %0 = vector.load %arg1[%c0, %c0_0] : memref<8x128xf32, #tpu.memory_space<vmem>>, vector<1x128xf32>
    %cst = arith.constant 0.001953125 : f32
    %1 = vector.broadcast %cst : f32 to vector<1x128xf32>
    %2 = arith.mulf %0, %1 : vector<1x128xf32>
    %c1 = arith.constant 1 : index
    %c0_1 = arith.constant 0 : index
    %3 = vector.load %arg1[%c1, %c0_1] : memref<8x128xf32, #tpu.memory_space<vmem>>, vector<1x128xf32>
    %cst_2 = arith.constant 0.001953125 : f32
    %4 = vector.broadcast %cst_2 : f32 to vector<1x128xf32>
    %5 = arith.mulf %3, %4 : vector<1x128xf32>
    %6 = arith.mulf %2, %2 : vector<1x128xf32>
    %7 = arith.subf %5, %6 : vector<1x128xf32>
    %cst_3 = arith.constant 0.000000e+00 : f32
    %8 = vector.broadcast %cst_3 : f32 to vector<1x128xf32>
    %9 = arith.maximumf %7, %8 : vector<1x128xf32>
    %cst_4 = arith.constant 9.99999974E-6 : f32
    %10 = vector.broadcast %cst_4 : f32 to vector<1x128xf32>
    %11 = arith.addf %9, %10 : vector<1x128xf32>
    %12 = math.rsqrt %11 : vector<1x128xf32>
    %c0_5 = arith.constant 0 : index
    %c0_6 = arith.constant 0 : index
    %13 = vector.load %arg2[%c0_5, %c0_6] : memref<8x128xf32, #tpu.memory_space<vmem>>, vector<1x128xf32>
    %c1_7 = arith.constant 1 : index
    %c0_8 = arith.constant 0 : index
    %14 = vector.load %arg2[%c1_7, %c0_8] : memref<8x128xf32, #tpu.memory_space<vmem>>, vector<1x128xf32>
    %15 = arith.mulf %12, %13 : vector<1x128xf32>
    %16 = arith.mulf %2, %15 : vector<1x128xf32>
    %17 = arith.subf %14, %16 : vector<1x128xf32>
    %c0_9 = arith.constant 0 : index
    %c0_10 = arith.constant 0 : index
    %18 = vector.load %arg3[%c0_9, %c0_10] : memref<128x128xf32, #tpu.memory_space<vmem>>, vector<128x128xf32>
    %19 = vector.broadcast %15 : vector<1x128xf32> to vector<128x128xf32>
    %20 = arith.mulf %18, %19 : vector<128x128xf32>
    %21 = vector.broadcast %17 : vector<1x128xf32> to vector<128x128xf32>
    %22 = arith.addf %20, %21 : vector<128x128xf32>
    %c2 = arith.constant 2 : index
    %c0_11 = arith.constant 0 : index
    %23 = vector.load %arg2[%c2, %c0_11] : memref<8x128xf32, #tpu.memory_space<vmem>>, vector<1x128xf32>
    %cst_12 = arith.constant 0.000000e+00 : f32
    %24 = vector.broadcast %cst_12 : f32 to vector<128x128xf32>
    %25 = arith.cmpf oge, %22, %24 : vector<128x128xf32>
    %26 = vector.broadcast %23 : vector<1x128xf32> to vector<128x128xf32>
    %27 = arith.mulf %26, %22 : vector<128x128xf32>
    %28 = arith.select %25, %22, %27 : vector<128x128xi1>, vector<128x128xf32>
    %c0_13 = arith.constant 0 : index
    %c0_14 = arith.constant 0 : index
    %29 = vector.load %arg4[%c0_13, %c0_14] : memref<128x128xf32, #tpu.memory_space<vmem>>, vector<128x128xf32>
    tpu.vector_store %arg4[%c0_13, %c0_14], %28 {strides = array<i32>} : memref<128x128xf32, #tpu.memory_space<vmem>>, vector<128x128xf32>,
    return
  }
  func.func @transform_0(%arg0: i32) -> (i32, i32) {
    %c0_i32 = arith.constant 0 : i32
    %c0_i32_0 = arith.constant 0 : i32
    %c0_i32_1 = arith.constant 0 : i32
    return %c0_i32, %c0_i32_0 : i32, i32
  }
  func.func @transform_1(%arg0: i32) -> (i32, i32) {
    %c0_i32 = arith.constant 0 : i32
    %c0_i32_0 = arith.constant 0 : i32
    %c0_i32_1 = arith.constant 0 : i32
    return %c0_i32, %c0_i32_0 : i32, i32
  }
  func.func @transform_2(%arg0: i32) -> (i32, i32) {
    %c0_i32 = arith.constant 0 : i32
    %c0_i32_0 = arith.constant 0 : i32
    return %arg0, %c0_i32 : i32, i32
  }
  func.func @transform_3(%arg0: i32) -> (i32, i32) {
    %c0_i32 = arith.constant 0 : i32
    %c0_i32_0 = arith.constant 0 : i32
    return %arg0, %c0_i32 : i32, i32
  }
}

</mosaic_0001>

<bundles_post_ra>
// kernel: conv_block_forward.2
= control target key start
LH: loop header
LB: loop body
LE: loop exit
PB: predicated region body
PF: predicated region fallthrough
CT: control target
= control target key end

     0   :  { %s674_s12 = smov 0   ;;  %s773_s0 = inlined_call_operand.vmem [shape: f32[512,36], index: 0, kind: input, shape index: {}]   ;;  %s774_s1 = inlined_call_operand.vmem [shape: f32[36,128], index: 1, kind: input, shape index: {}]   ;;  %s775_s2 = inlined_call_operand.vmem [shape: f32[512,128], index: 2, kind: output, shape index: {0}]   ;;  %s776_s3 = inlined_call_operand.vmem [shape: f32[8,128], index: 3, kind: output, shape index: {1}]  }
   0x1 LB: > { %s538_s13 = sadd.s32 4294967295, %s651_s12   ;;  %p542_p0 = scmp.ge.s32.totalorder %s651_s12, 1  ;;  %s651_s12 = sphi %s674_s12, %s14_s12  }
   0x2   : > { %p136_p1 = scmp.lt.s32.totalorder %s651_s12, 5 }
   0x4   : > { %p137_p2 = pnand %p542_p0, %p136_p1 }
   0x5   : > { %s543_s14 = sshll.u32 (!%p137_p2), %s538_s13, 4  ;;  %p547_p4 = scmp.ne.s32.totalorder (!%p137_p2), %s538_s13, 0 }
   0x6   : > { %140 = sbr.rel (%p137_p2) target bundleno = 295 (0x127), region = 28  ;;  %p161_p3 = scmp.lt.s32.totalorder (!%p137_p2), %s543_s14, 63 }
   0xd   : > { %s778_s14 = smov (!%p161_p3, %s543_s14), 63  ;;  %175 = sbr.rel (%p547_p4) target bundleno = 20 (0x14), region = 32 }
   0xe   : > { %s544_s15 = sshll.u32 %s778_s14, 3  ;;  %v653_v0 = vmov (!%p547_p4), 0.0  }
   0xf   : > { %s685_s18 = scalar_lea.vmem %s773_s0, %s544_s15  ;;  %s690_s21 = scalar_lea.vmem %s775_s2, %s544_s15  ;;  %176 = vst [vmem:[%s776_s3] sm:$0xff] (!%p547_p4), %v653_v0 }
  0x14 PF: > { %v193_v1 = vld [vmem:[%s774_s1] sm:$0xff]  ;;  %v194_v2 = vld [vmem:[%s774_s1 + $0x8] sm:$0xff]  ;;  %v195_v3 = vld [vmem:[%s774_s1 + $0x10] sm:$0xff]  ;;  %vm198_vm0 = vcmask 293888   ;;  %vm247_vm1 = vcmask 1043456  }
  0x15   : > { %v622_v4 = vpack.c.bf16 %v194_v2, %v193_v1  ;;  %v196_v5 = vld [vmem:[%s774_s1 + $0x18] sm:$0xff]  ;;  %v177_v6 = vld [vmem:[%s685_s18] sm:$0xff]  ;;  %v178_v10 = vld [vmem:[%s685_s18 + $0x8] sm:$0xff] }
  0x16   : > { %v626_v7 = vpack.c.bf16 %v196_v5, %v195_v3  ;;  %598 = vmatprep.mubr.msk.f32.mxu0 %vm198_vm0, %v177_v6  ;;  %v185_v8 = vld [vmem:[%s685_s18 + $0x40] sm:$0xff]  ;;  %v186_v11 = vld [vmem:[%s685_s18 + $0x48] sm:$0xff]  ;;  %v179_v12 = vld [vmem:[%s685_s18 + $0x10] sm:$0xff] }
  0x17   : > { %623 = vmatprep.subr.bf16.mxu0 %v622_v4  ;;  %630 = vmatprep.subr.bf16.mxu1 %v622_v4  ;;  %v197_v9 = vld [vmem:[%s774_s1 + $0x20] sm:$0xf]  ;;  %v187_v13 = vld [vmem:[%s685_s18 + $0x50] sm:$0xff]  ;;  %v180_v14 = vld [vmem:[%s685_s18 + $0x18] sm:$0xff] }
  0x18   : > { %625 = vmatpush3.bf16.msra.mxu0 %v622_v4  ;;  %633 = vmatpush3.bf16.msra.mxu1 %v622_v4  ;;  %v188_v15 = vld [vmem:[%s685_s18 + $0x58] sm:$0xff]  ;;  %v181_v16 = vld [vmem:[%s685_s18 + $0x20] sm:$0xff]  ;;  %v182_v18 = vld [vmem:[%s685_s18 + $0x28] sm:$0xff] }
  0x19   : > { %627 = vmatprep.subr.bf16.mxu0 %v626_v7  ;;  %631 = vmatprep.subr.bf16.mxu1 %v626_v7  ;;  %v189_v17 = vld [vmem:[%s685_s18 + $0x60] sm:$0xff]  ;;  %v190_v19 = vld [vmem:[%s685_s18 + $0x68] sm:$0xff]  ;;  %v183_v20 = vld [vmem:[%s685_s18 + $0x30] sm:$0xff] }
  0x1a   : > { %610 = vmatprep.mubr.msk.f32.mxu1 %vm198_vm0, %v185_v8  ;;  %v191_v21 = vld [vmem:[%s685_s18 + $0x70] sm:$0xff]  ;;  %v184_v22 = vld [vmem:[%s685_s18 + $0x38] sm:$0xff] }
  0x1b   : > { %v192_v23 = vld [vmem:[%s685_s18 + $0x78] sm:$0xff] }
  0x1c   : > { %629 = vmatpush3.bf16.msra.mxu0 %v626_v7  ;;  %634 = vmatpush3.bf16.msra.mxu1 %v626_v7 }
  0x1d   : > { %596 = vmatprep.subr.msk.mxu0 %vm247_vm1, %v197_v9  ;;  %632 = vmatprep.subr.msk.mxu1 %vm247_vm1, %v197_v9 }
  0x20   : > { %597 = vmatpush3.msk.msra.mxu0 %vm247_vm1, %v197_v9  ;;  %635 = vmatpush3.msk.msra.mxu1 %vm247_vm1, %v197_v9 }
  0x21   : > { %599 = vmatmul.mubr.msk.f32.vlgmr.msra.gmra.mrb[0].mxu0 %vm198_vm0, %v178_v10  ;;  %611 = vmatmul.mubr.msk.f32.vlgmr.msra.gmra.mrb[0].mxu1 %vm198_vm0, %v186_v11 }
  0x22   : > { %601 = vmatprep.mubr.msk.f32.mxu0 %vm198_vm0, %v179_v12  ;;  %613 = vmatprep.mubr.msk.f32.mxu1 %vm198_vm0, %v187_v13 }
  0x25   : > { %602 = vmatmul.mubr.msk.f32.gmra.mrb[2].mxu0 %vm198_vm0, %v180_v14  ;;  %614 = vmatmul.mubr.msk.f32.gmra.mrb[2].mxu1 %vm198_vm0, %v188_v15 }
  0x26   : > { %604 = vmatprep.mubr.msk.f32.mxu0 %vm198_vm0, %v181_v16  ;;  %616 = vmatprep.mubr.msk.f32.mxu1 %vm198_vm0, %v189_v17 }
  0x29   : > { %605 = vmatmul.mubr.msk.f32.gmra.mrb[4].mxu0 %vm198_vm0, %v182_v18  ;;  %617 = vmatmul.mubr.msk.f32.gmra.mrb[4].mxu1 %vm198_vm0, %v190_v19 }
  0x2a   : > { %607 = vmatprep.mubr.msk.f32.mxu0 %vm198_vm0, %v183_v20  ;;  %619 = vmatprep.mubr.msk.f32.mxu1 %vm198_vm0, %v191_v21 }
  0x2d   : > { %608 = vmatmul.mubr.msk.f32.gmra.mrb[6].mxu0 %vm198_vm0, %v184_v22  ;;  %620 = vmatmul.mubr.msk.f32.gmra.mrb[6].mxu1 %vm198_vm0, %v192_v23 }
  0xf4   : > { %v600_v24 = vpop.f32.mrb[0].mxu0  ;;  %v612_v25 = vpop.f32.mrb[0].mxu1 }
  0xf5   : > { %397 = vst [vmem:[%s690_s21 + $0x8] sm:$0xff] %v600_v24  ;;  %v438_v26 = vmul.f32 %v600_v24, %v600_v24  ;;  %v317_v27 = vpop.f32.mrb[1].mxu0  ;;  %405 = vst [vmem:[%s690_s21 + $0x48] sm:$0xff] %v612_v25  ;;  %v357_v28 = vpop.f32.mrb[1].mxu1  ;;  %v446_v0 = vmul.f32 %v612_v25, %v612_v25 }
  0xf6   : > { %396 = vst [vmem:[%s690_s21] sm:$0xff] %v317_v27  ;;  %v413_v29 = vadd.f32 %v600_v24, %v317_v27  ;;  %v437_v30 = vmul.f32 %v317_v27, %v317_v27  ;;  %404 = vst [vmem:[%s690_s21 + $0x40] sm:$0xff] %v357_v28  ;;  %v445_v61 = vmul.f32 %v357_v28, %v357_v28 }
  0xf8   : > { %v453_v31 = vadd.f32 %v438_v26, %v437_v30  ;;  %v603_v32 = vpop.f32.mrb[2].mxu0  ;;  %v615_v33 = vpop.f32.mrb[2].mxu1 }
  0xf9   : > { %399 = vst [vmem:[%s690_s21 + $0x18] sm:$0xff] %v603_v32  ;;  %v327_v34 = vpop.f32.mrb[3].mxu0  ;;  %407 = vst [vmem:[%s690_s21 + $0x58] sm:$0xff] %v615_v33  ;;  %v367_v35 = vpop.f32.mrb[3].mxu1  ;;  %v440_v38 = vmul.f32 %v603_v32, %v603_v32  ;;  %v448_v6 = vmul.f32 %v615_v33, %v615_v33 }
  0xfa   : > { %398 = vst [vmem:[%s690_s21 + $0x10] sm:$0xff] %v327_v34  ;;  %v414_v36 = vadd.f32 %v413_v29, %v327_v34  ;;  %v439_v37 = vmul.f32 %v327_v34, %v327_v34  ;;  %406 = vst [vmem:[%s690_s21 + $0x50] sm:$0xff] %v367_v35  ;;  %v447_v3 = vmul.f32 %v367_v35, %v367_v35  ;;  %v436_v34 = vld [vmem:[%s776_s3 + $0x1] sm:$0x1] }
  0xfc   : > { %v454_v39 = vadd.f32 %v453_v31, %v439_v37  ;;  %v606_v40 = vpop.f32.mrb[4].mxu0  ;;  %v415_v41 = vadd.f32 %v603_v32, %v414_v36  ;;  %v618_v42 = vpop.f32.mrb[4].mxu1  ;;  %v412_v31 = vld [vmem:[%s776_s3] sm:$0x1] }
  0xfd   : > { %401 = vst [vmem:[%s690_s21 + $0x28] sm:$0xff] %v606_v40  ;;  %v337_v43 = vpop.f32.mrb[5].mxu0  ;;  %409 = vst [vmem:[%s690_s21 + $0x68] sm:$0xff] %v618_v42  ;;  %v377_v44 = vpop.f32.mrb[5].mxu1  ;;  %v442_v48 = vmul.f32 %v606_v40, %v606_v40  ;;  %v450_v12 = vmul.f32 %v618_v42, %v618_v42 }
  0xfe   : > { %400 = vst [vmem:[%s690_s21 + $0x20] sm:$0xff] %v337_v43  ;;  %v416_v45 = vadd.f32 %v415_v41, %v337_v43  ;;  %v441_v46 = vmul.f32 %v337_v43, %v337_v43  ;;  %v455_v47 = vadd.f32 %v454_v39, %v440_v38  ;;  %408 = vst [vmem:[%s690_s21 + $0x60] sm:$0xff] %v377_v44 }
  0xff   : > { %v449_v9 = vmul.f32 %v377_v44, %v377_v44 }
 0x100   : > { %v456_v49 = vadd.f32 %v455_v47, %v441_v46  ;;  %v609_v50 = vpop.f32.mrb[6].mxu0  ;;  %v417_v51 = vadd.f32 %v606_v40, %v416_v45  ;;  %v621_v52 = vpop.f32.mrb[6].mxu1 }
 0x101   : > { %403 = vst [vmem:[%s690_s21 + $0x38] sm:$0xff] %v609_v50  ;;  %v347_v53 = vpop.f32.mrb[7].mxu0  ;;  %411 = vst [vmem:[%s690_s21 + $0x78] sm:$0xff] %v621_v52  ;;  %v387_v54 = vpop.f32.mrb[7].mxu1  ;;  %v444_v58 = vmul.f32 %v609_v50, %v609_v50  ;;  %v452_v18 = vmul.f32 %v621_v52, %v621_v52 }
 0x102   : > { %402 = vst [vmem:[%s690_s21 + $0x30] sm:$0xff] %v347_v53  ;;  %v418_v55 = vadd.f32 %v417_v51, %v347_v53  ;;  %v443_v56 = vmul.f32 %v347_v53, %v347_v53  ;;  %v457_v57 = vadd.f32 %v456_v49, %v442_v48  ;;  %410 = vst [vmem:[%s690_s21 + $0x70] sm:$0xff] %v387_v54 }
 0x103   : > { %v451_v15 = vmul.f32 %v387_v54, %v387_v54 }
 0x104   : > { %v419_v59 = vadd.f32 %v609_v50, %v418_v55  ;;  %v458_v60 = vadd.f32 %v457_v57, %v443_v56 }
 0x106   : > { %v459_v62 = vadd.f32 %v458_v60, %v444_v58  ;;  %v420_v63 = vadd.f32 %v419_v59, %v357_v28 }
 0x108   : > { %v460_v1 = vadd.f32 %v459_v62, %v445_v61  ;;  %v421_v2 = vadd.f32 %v612_v25, %v420_v63 }
 0x10a   : > { %v422_v4 = vadd.f32 %v421_v2, %v367_v35  ;;  %v461_v5 = vadd.f32 %v460_v1, %v446_v0 }
 0x10c   : > { %v462_v7 = vadd.f32 %v461_v5, %v447_v3  ;;  %v423_v8 = vadd.f32 %v615_v33, %v422_v4 }
 0x10e   : > { %v424_v10 = vadd.f32 %v423_v8, %v377_v44  ;;  %v463_v11 = vadd.f32 %v462_v7, %v448_v6 }
 0x110   : > { %v464_v13 = vadd.f32 %v463_v11, %v449_v9  ;;  %v425_v14 = vadd.f32 %v618_v42, %v424_v10 }
 0x112   : > { %v426_v16 = vadd.f32 %v425_v14, %v387_v54  ;;  %v465_v17 = vadd.f32 %v464_v13, %v450_v12 }
 0x114   : > { %v427_v19 = vadd.f32 %v621_v52, %v426_v16  ;;  %v466_v20 = vadd.f32 %v465_v17, %v451_v15 }
 0x116   : > { %v428_v21 = vrot.slane %v427_v19, 4  ;;  %v467_v22 = vadd.f32 %v466_v20, %v452_v18 }
 0x118   : > { %v429_v23 = vadd.f32 %v428_v21, %v427_v19  ;;  %v468_v24 = vrot.slane %v467_v22, 4 }
 0x11a   : > { %v430_v25 = vrot.slane %v429_v23, 2  ;;  %v469_v26 = vadd.f32 %v468_v24, %v467_v22 }
 0x11c   : > { %v431_v27 = vadd.f32 %v430_v25, %v429_v23  ;;  %v470_v28 = vrot.slane %v469_v26, 2 }
 0x11e   : > { %v432_v29 = vrot.slane %v431_v27, 1  ;;  %v471_v30 = vadd.f32 %v470_v28, %v469_v26 }
 0x120   : > { %v433_v32 = vadd.f32 %v432_v29, %v431_v27  ;;  %v472_v33 = vrot.slane %v471_v30, 1 }
 0x122   : > { %v434_v35 = vadd.f32 %v433_v32, %v412_v31  ;;  %v473_v36 = vadd.f32 %v472_v33, %v471_v30 }
 0x124   : > { %435 = vst [vmem:[%s776_s3] sm:$0x1] %v434_v35  ;;  %v474_v37 = vadd.f32 %v473_v36, %v436_v34 }
 0x126   : > { %475 = vst [vmem:[%s776_s3 + $0x1] sm:$0x1] %v474_v37 }
 0x127 PF: > { %s14_s12 = sadd.s32 1, %s651_s12  }
 0x128   : > { %p11_p5 = scmp.ge.s32.totalorder %s14_s12, 6  }
 0x12a   :  { %13 = sbr.rel (!%p11_p5) target bundleno = 1 (0x1), region = 70 }

// kernel: conv_block_forward.3
= control target key start
LH: loop header
LB: loop body
LE: loop exit
PB: predicated region body
PF: predicated region fallthrough
CT: control target
= control target key end

     0   :  { %s419_s12 = smov 0   ;;  %s551_s0 = inlined_call_operand.vmem [shape: f32[8,128], index: 0, kind: input, shape index: {}]   ;;  %s552_s1 = inlined_call_operand.vmem [shape: f32[8,128], index: 1, kind: input, shape index: {}]   ;;  %s553_s2 = inlined_call_operand.vmem [shape: f32[512,128], index: 2, kind: input, shape index: {}]   ;;  %s554_s3 = inlined_call_operand.vmem [shape: f32[512,128], index: 3, kind: output, shape index: {}]  }
   0x1 LB: > { %s369_s13 = sadd.s32 4294967295, %s397_s12   ;;  %p373_p0 = scmp.ge.s32.totalorder %s397_s12, 1  ;;  %s397_s12 = sphi %s419_s12, %s13_s12  }
   0x2   : > { %p138_p1 = scmp.lt.s32.totalorder %s397_s12, 5 }
   0x4   : > { %p139_p2 = pnand %p373_p0, %p138_p1 }
   0x5   : > { %v174_v0 = vld [vmem:[%s551_s0] sm:$0x1] (!%p139_p2)  ;;  %v176_v1 = vld [vmem:[%s551_s0 + $0x1] sm:$0x1] (!%p139_p2)  ;;  %s374_s18 = sshll.u32 (!%p139_p2), %s369_s13, 4  ;;  %v204_v8 = vlaneseq (!%p139_p2) }
   0x6   : > { %142 = sbr.rel (%p139_p2) target bundleno = 56 (0x38), region = 32  ;;  %v175_v2 = vmul.f32 (!%p139_p2), 0.001953125, %v174_v0  ;;  %v177_v3 = vmul.f32 (!%p139_p2), 0.001953125, %v176_v1  ;;  %p163_p3 = scmp.lt.s32.totalorder (!%p139_p2), %s374_s18, 63  ;;  %v183_v10 = vld [vmem:[%s552_s1] sm:$0x1] (!%p139_p2) }
   0x7   : > { %v205_v9 = vshrl.u32 (!%p139_p2), %v204_v8, 7  ;;  %v184_v13 = vld [vmem:[%s552_s1 + $0x1] sm:$0x1] (!%p139_p2)  ;;  %v480_v43 = vld [vmem:[%s552_s1 + $0x2] ss:$0 sm:$0xff] (!%p139_p2) }
   0x8   : > { %v178_v4 = vmul.f32 (!%p139_p2), %v175_v2, %v175_v2 }
   0x9   : > { %v206_v11 = vsub.s32 (!%p139_p2), 0, %v205_v9 }
   0xa   : > { %v179_v5 = vsub.f32 (!%p139_p2), %v177_v3, %v178_v4 }
   0xc   : > { %v180_v6 = vmax.f32 (!%p139_p2), %v179_v5, 0.0 }
   0xd   : > { %s556_s18 = smov (!%p163_p3, %s374_s18), 63 }
   0xe   : > { %v181_v7 = vadd.f32 1e-05, %v180_v6  ;;  %s375_s19 = sshll.u32 %s556_s18, 3 }
   0xf   : > { %s441_s22 = scalar_lea.vmem %s553_s2, %s375_s19  ;;  %s501_s4 = scalar_lea.vmem %s554_s3, %s375_s19 }
  0x10   : > { %389 = vrsqrt.f32 %v181_v7  ;;  %v188_v15 = vld [vmem:[%s441_s22] sm:$0xff]  ;;  %v189_v16 = vld [vmem:[%s441_s22 + $0x8] sm:$0xff]  ;;  %v190_v17 = vld [vmem:[%s441_s22 + $0x10] sm:$0xff] }
  0x11   : > { %v191_v18 = vld [vmem:[%s441_s22 + $0x18] sm:$0xff]  ;;  %v192_v19 = vld [vmem:[%s441_s22 + $0x20] sm:$0xff]  ;;  %v193_v22 = vld [vmem:[%s441_s22 + $0x28] sm:$0xff] }
  0x12   : > { %v194_v23 = vld [vmem:[%s441_s22 + $0x30] sm:$0xff]  ;;  %v195_v24 = vld [vmem:[%s441_s22 + $0x38] sm:$0xff]  ;;  %v196_v25 = vld [vmem:[%s441_s22 + $0x40] sm:$0xff] }
  0x13   : > { %v197_v26 = vld [vmem:[%s441_s22 + $0x48] sm:$0xff]  ;;  %v198_v27 = vld [vmem:[%s441_s22 + $0x50] sm:$0xff]  ;;  %v199_v32 = vld [vmem:[%s441_s22 + $0x58] sm:$0xff] }
  0x14   : > { %v200_v33 = vld [vmem:[%s441_s22 + $0x60] sm:$0xff]  ;;  %v201_v34 = vld [vmem:[%s441_s22 + $0x68] sm:$0xff] }
  0x1a   : > { %v390_v12 = vpop.eup %389 }
  0x1b   : > { %v185_v14 = vmul.f32 %v390_v12, %v183_v10 }
  0x1d   : > { %v186_v20 = vmul.f32 %v185_v14, %v175_v2  ;;  %v454_v21 = vrot.slane %v185_v14, %v206_v11  ;;  %v202_v14 = vld [vmem:[%s441_s22 + $0x70] sm:$0xff] }
  0x1f   : > { %v187_v28 = vsub.f32 %v184_v13, %v186_v20  ;;  %v208_v29 = vmul.f32 %v454_v21, %v188_v15  ;;  %v209_v30 = vmul.f32 %v454_v21, %v189_v16  ;;  %v210_v31 = vmul.f32 %v454_v21, %v190_v17  ;;  %v203_v17 = vld [vmem:[%s441_s22 + $0x78] sm:$0xff] }
  0x20   : > { %v211_v35 = vmul.f32 %v454_v21, %v191_v18  ;;  %v212_v36 = vmul.f32 %v454_v21, %v192_v19  ;;  %v213_v37 = vmul.f32 %v454_v21, %v193_v22  ;;  %v214_v38 = vmul.f32 %v454_v21, %v194_v23 }
  0x21   : > { %v472_v39 = vrot.slane %v187_v28, %v206_v11  ;;  %v215_v40 = vmul.f32 %v454_v21, %v195_v24  ;;  %v216_v41 = vmul.f32 %v454_v21, %v196_v25  ;;  %v217_v42 = vmul.f32 %v454_v21, %v197_v26 }
  0x22   : > { %v218_v44 = vmul.f32 %v454_v21, %v198_v27  ;;  %v219_v45 = vmul.f32 %v454_v21, %v199_v32  ;;  %v220_v46 = vmul.f32 %v454_v21, %v200_v33  ;;  %v486_v47 = vmul.f32 %v454_v21, %v201_v34 }
  0x23   : > { %v228_v48 = vadd.f32 %v472_v39, %v208_v29  ;;  %v229_v49 = vadd.f32 %v472_v39, %v209_v30  ;;  %v230_v50 = vadd.f32 %v472_v39, %v210_v31  ;;  %v231_v51 = vadd.f32 %v472_v39, %v211_v35 }
  0x24   : > { %v232_v52 = vadd.f32 %v472_v39, %v212_v36  ;;  %v233_v53 = vadd.f32 %v472_v39, %v213_v37  ;;  %v234_v54 = vadd.f32 %v472_v39, %v214_v38  ;;  %v235_v55 = vadd.f32 %v472_v39, %v215_v40 }
  0x25   : > { %vm245_vm0 = vcmp.ge.f32.partialorder %v228_v48, 0.0  ;;  %v265_v56 = vmul.f32 %v480_v43, %v228_v48  ;;  %vm246_vm1 = vcmp.ge.f32.partialorder %v229_v49, 0.0  ;;  %v266_v57 = vmul.f32 %v480_v43, %v229_v49 }
  0x26   : > { %vm247_vm2 = vcmp.ge.f32.partialorder %v230_v50, 0.0  ;;  %v267_v58 = vmul.f32 %v480_v43, %v230_v50  ;;  %vm248_vm3 = vcmp.ge.f32.partialorder %v231_v51, 0.0  ;;  %v268_v59 = vmul.f32 %v480_v43, %v231_v51 }
  0x27   : > { %v281_v60 = vsel %vm245_vm0, %v228_v48, %v265_v56  ;;  %v282_v61 = vsel %vm246_vm1, %v229_v49, %v266_v57  ;;  %vm249_vm4 = vcmp.ge.f32.partialorder %v232_v52, 0.0  ;;  %v269_v62 = vmul.f32 %v480_v43, %v232_v52 }
  0x28   : > { %297 = vst [vmem:[%s501_s4] sm:$0xff] %v281_v60  ;;  %298 = vst [vmem:[%s501_s4 + $0x8] sm:$0xff] %v282_v61  ;;  %v283_v63 = vsel %vm247_vm2, %v230_v50, %v267_v58  ;;  %v284_v0 = vsel %vm248_vm3, %v231_v51, %v268_v59  ;;  %vm250_vm5 = vcmp.ge.f32.partialorder %v233_v53, 0.0  ;;  %v270_v1 = vmul.f32 %v480_v43, %v233_v53 }
  0x29   : > { %299 = vst [vmem:[%s501_s4 + $0x10] sm:$0xff] %v283_v63  ;;  %300 = vst [vmem:[%s501_s4 + $0x18] sm:$0xff] %v284_v0  ;;  %v285_v2 = vsel %vm249_vm4, %v232_v52, %v269_v62  ;;  %vm251_vm6 = vcmp.ge.f32.partialorder %v234_v54, 0.0  ;;  %v271_v3 = vmul.f32 %v480_v43, %v234_v54  ;;  %vm252_vm7 = vcmp.ge.f32.partialorder %v235_v55, 0.0 }
  0x2a   : > { %301 = vst [vmem:[%s501_s4 + $0x20] sm:$0xff] %v285_v2  ;;  %v286_v4 = vsel %vm250_vm5, %v233_v53, %v270_v1  ;;  %v272_v5 = vmul.f32 %v480_v43, %v235_v55  ;;  %v236_v6 = vadd.f32 %v472_v39, %v216_v41  ;;  %v237_v7 = vadd.f32 %v472_v39, %v217_v42 }
  0x2b   : > { %302 = vst [vmem:[%s501_s4 + $0x28] sm:$0xff] %v286_v4  ;;  %v287_v8 = vsel %vm251_vm6, %v234_v54, %v271_v3  ;;  %v238_v9 = vadd.f32 %v472_v39, %v218_v44  ;;  %v239_v10 = vadd.f32 %v472_v39, %v219_v45  ;;  %v240_v11 = vadd.f32 %v472_v39, %v220_v46 }
  0x2c   : > { %303 = vst [vmem:[%s501_s4 + $0x30] sm:$0xff] %v287_v8  ;;  %v288_v12 = vsel %vm252_vm7, %v235_v55, %v272_v5  ;;  %vm253_vm8 = vcmp.ge.f32.partialorder %v236_v6, 0.0  ;;  %v273_v13 = vmul.f32 %v480_v43, %v236_v6  ;;  %vm254_vm9 = vcmp.ge.f32.partialorder %v237_v7, 0.0 }
  0x2d   : > { %304 = vst [vmem:[%s501_s4 + $0x38] sm:$0xff] %v288_v12  ;;  %v274_v15 = vmul.f32 %v480_v43, %v237_v7  ;;  %vm255_vm10 = vcmp.ge.f32.partialorder %v238_v9, 0.0  ;;  %v275_v16 = vmul.f32 %v480_v43, %v238_v9  ;;  %vm256_vm11 = vcmp.ge.f32.partialorder %v239_v10, 0.0 }
  0x2e   : > { %v289_v18 = vsel %vm253_vm8, %v236_v6, %v273_v13  ;;  %v276_v19 = vmul.f32 %v480_v43, %v239_v10  ;;  %vm257_vm12 = vcmp.ge.f32.partialorder %v240_v11, 0.0  ;;  %v277_v20 = vmul.f32 %v480_v43, %v240_v11 }
  0x2f   : > { %305 = vst [vmem:[%s501_s4 + $0x40] sm:$0xff] %v289_v18  ;;  %v290_v22 = vsel %vm254_vm9, %v237_v7, %v274_v15  ;;  %v291_v23 = vsel %vm255_vm10, %v238_v9, %v275_v16  ;;  %v241_v24 = vadd.f32 %v472_v39, %v486_v47  ;;  %v222_v25 = vmul.f32 %v454_v21, %v202_v14 }
  0x30   : > { %306 = vst [vmem:[%s501_s4 + $0x48] sm:$0xff] %v290_v22  ;;  %307 = vst [vmem:[%s501_s4 + $0x50] sm:$0xff] %v291_v23  ;;  %v292_v26 = vsel %vm256_vm11, %v239_v10, %v276_v19  ;;  %v293_v27 = vsel %vm257_vm12, %v240_v11, %v277_v20  ;;  %v223_v28 = vmul.f32 %v454_v21, %v203_v17 }
  0x31   : > { %308 = vst [vmem:[%s501_s4 + $0x58] sm:$0xff] %v292_v26  ;;  %309 = vst [vmem:[%s501_s4 + $0x60] sm:$0xff] %v293_v27  ;;  %vm258_vm13 = vcmp.ge.f32.partialorder %v241_v24, 0.0  ;;  %v278_v29 = vmul.f32 %v480_v43, %v241_v24  ;;  %v242_v30 = vadd.f32 %v472_v39, %v222_v25 }
  0x32   : > { %v243_v31 = vadd.f32 %v472_v39, %v223_v28 }
  0x33   : > { %v294_v32 = vsel %vm258_vm13, %v241_v24, %v278_v29  ;;  %vm259_vm14 = vcmp.ge.f32.partialorder %v242_v30, 0.0  ;;  %v279_v33 = vmul.f32 %v480_v43, %v242_v30 }
  0x34   : > { %310 = vst [vmem:[%s501_s4 + $0x68] sm:$0xff] %v294_v32  ;;  %vm260_vm15 = vcmp.ge.f32.partialorder %v243_v31, 0.0  ;;  %v280_v34 = vmul.f32 %v480_v43, %v243_v31 }
  0x35   : > { %v295_v35 = vsel %vm259_vm14, %v242_v30, %v279_v33 }
  0x36   : > { %311 = vst [vmem:[%s501_s4 + $0x70] sm:$0xff] %v295_v35  ;;  %v296_v21 = vsel %vm260_vm15, %v243_v31, %v280_v34 }
  0x37   : > { %312 = vst [vmem:[%s501_s4 + $0x78] sm:$0xff] %v296_v21 }
  0x38 PF: > { %s13_s12 = sadd.s32 1, %s397_s12  }
  0x39   : > { %p10_p4 = scmp.ge.s32.totalorder %s13_s12, 6  }
  0x3b   :  { %12 = sbr.rel (!%p10_p4) target bundleno = 1 (0x1), region = 62 }

</bundles_post_ra>
